<compile_context>
chip_gen: v6e
topology: v6e:2x2x1
jax: 0.10.0
libtpu: 0.0.40
codegen_flags: <defaults>
</compile_context>

<pallas_src>
import functools

import jax
import jax.numpy as jnp
from jax.experimental import pallas as pl
from jax.experimental.pallas import tpu as pltpu


def _round_up(x, m):
    return (x + m - 1) // m * m


@functools.lru_cache(maxsize=1)
def _vmem_capacity_bytes():
    """Per-generation VMEM capacity; conservative 64 MiB fallback (v7x/TC)."""
    try:
        cap = int(getattr(pltpu.get_tpu_info(), "vmem_capacity_bytes"))
        return cap if cap > 0 else 64 * 1024 * 1024
    except Exception:
        return 64 * 1024 * 1024


def _pick_tk(k_total, tk_req):
    """Largest multiple of 128 that divides k_total and is <= tk_req."""
    best, t = 128, 128
    limit = min(max(tk_req, 128), k_total)
    while t <= limit:
        if k_total % t == 0:
            best = t
        t += 128
    return best


# ----------------------------------------------------------------------------
# Kernels
# ----------------------------------------------------------------------------
def _fused_kernel(x_ref, w6_ref, b6_ref, w7_ref, b7_ref, o_ref):
    """Single-pass schedule: w6 resident, whole fc6 contraction in one dot."""
    xv = x_ref[...]
    if xv.dtype != w6_ref.dtype:              # bf16-weight path: feed MXU bf16
        xv = xv.astype(w6_ref.dtype)
    h = jnp.dot(xv, w6_ref[...], preferred_element_type=jnp.float32)
    h = jnp.maximum(h + b6_ref[...], 0.0)     # bias + relu in f32
    if w7_ref.dtype != jnp.float32:
        h = h.astype(w7_ref.dtype)
    o = jnp.dot(h, w7_ref[...], preferred_element_type=jnp.float32)
    o_ref[...] = jnp.maximum(o + b7_ref[...], 0.0).astype(o_ref.dtype)


def _streamed_kernel(x_ref, w6_ref, b6_ref, w7_ref, b7_ref, o_ref, acc_ref):
    """K-streamed schedule: fc6 accumulated over the last ('arbitrary') axis."""
    k = pl.program_id(1)
    xv = x_ref[...]
    if xv.dtype != w6_ref.dtype:
        xv = xv.astype(w6_ref.dtype)
    p = jnp.dot(xv, w6_ref[...], preferred_element_type=jnp.float32)

    @pl.when(k == 0)                           # direct write: no zero-init RMW
    def _():
        acc_ref[...] = p

    @pl.when(k > 0)
    def _():
        acc_ref[...] += p

    @pl.when(k == pl.num_programs(1) - 1)      # epilogue on the last K step
    def _():
        h = jnp.maximum(acc_ref[...] + b6_ref[...], 0.0)
        if w7_ref.dtype != jnp.float32:
            h = h.astype(w7_ref.dtype)
        o = jnp.dot(h, w7_ref[...], preferred_element_type=jnp.float32)
        o_ref[...] = jnp.maximum(o + b7_ref[...], 0.0).astype(o_ref.dtype)


# ----------------------------------------------------------------------------
# One-time parameter prep (outside the hot path)
# ----------------------------------------------------------------------------
def prepare_params(w6, b6, w7, b7, *, weight_dtype=jnp.bfloat16):
    """Transpose PyTorch-layout (out,in) weights to (in,out), pad, cast.

    - K (in_channels) padded to a 128 multiple, or a 1024 multiple for large K
      so the streamed schedule never collapses tk to a tiny divisor.
    - representation_size padded to a 128 multiple (lane-dense output stores);
      the wrapper slices back with `out_features=`.
    - Weights cast to `weight_dtype` (default bf16). Biases stay f32;
      accumulation in the kernel is always f32.
    """
    w6_t = jnp.asarray(w6, dtype=jnp.float32).T          # (in, R)
    w7_t = jnp.asarray(w7, dtype=jnp.float32).T          # (R, R)
    b6_2d = jnp.asarray(b6, dtype=jnp.float32).reshape(1, -1)
    b7_2d = jnp.asarray(b7, dtype=jnp.float32).reshape(1, -1)

    k_in, rep = w6_t.shape
    rep_pad = _round_up(rep, 128)
    k_align = 1024 if k_in > 4096 else 128
    k_pad = _round_up(k_in, k_align)

    if (k_pad, rep_pad) != (k_in, rep):                  # zero pad: no-op math
        w6_t = jnp.pad(w6_t, ((0, k_pad - k_in), (0, rep_pad - rep)))
        w7_t = jnp.pad(w7_t, ((0, rep_pad - rep), (0, rep_pad - rep)))
        b6_2d = jnp.pad(b6_2d, ((0, 0), (0, rep_pad - rep)))
        b7_2d = jnp.pad(b7_2d, ((0, 0), (0, rep_pad - rep)))

    return (w6_t.astype(weight_dtype), b6_2d, w7_t.astype(weight_dtype), b7_2d)


# ----------------------------------------------------------------------------
# Host wrapper
# ----------------------------------------------------------------------------
@functools.partial(
    jax.jit,
    static_argnames=("tm", "tk", "out_features", "out_dtype", "residency"))
def two_mlp_head(x, w6_t, b6_2d, w7_t, b7_2d, *, tm=256, tk=2048,
                 out_features=None, out_dtype=None, residency="auto"):
    """x: (N, C, H, W).  Params come from prepare_params()."""
    n = x.shape[0]
    k_in = 1
    for d in x.shape[1:]:
        k_in *= d
    k_total, rep = w6_t.shape
    out_dtype = x.dtype if out_dtype is None else out_dtype
    xb = jnp.dtype(x.dtype).itemsize
    wb = jnp.dtype(w6_t.dtype).itemsize
    ob = jnp.dtype(out_dtype).itemsize

    # Row tiling -- megacore aware: give both v7x TensorCores at least one tile.
    tm = _round_up(max(8, min(tm, _round_up(n, 8))), 8)
    n_pad8 = _round_up(n, 8)
    if n_pad8 >= 16 and n_pad8 // tm < 2:
        tm = _round_up((n_pad8 + 1) // 2, 8)
    n_pad = _round_up(n, tm)

    # Flatten exactly like torch's x.flatten(start_dim=1); pad rows/K.
    x2d = x.reshape(n, k_in)
    if n_pad != n or k_total != k_in:
        x2d = jnp.pad(x2d, ((0, n_pad - n), (0, k_total - k_in)))

    budget = int(_vmem_capacity_bytes() * 0.85)          # per-generation budget
    slack = 2 * 1024 * 1024

    # Resident footprint, conservatively counted with 2x (double) buffering.
    resident_bytes = (2 * tm * k_total * xb + 2 * k_total * rep * wb
                      + 2 * rep * rep * wb + 4 * rep * 4
                      + 2 * tm * rep * ob + slack)
    use_resident = (residency == "resident"
                    or (residency == "auto" and resident_bytes <= budget))

    bias_c = jnp.float32  # biases always f32
    del bias_c

    if use_resident:
        vmem_limit = int(min(max(resident_bytes, 32 * 1024 * 1024), budget))
        out = pl.pallas_call(
            _fused_kernel,
            out_shape=jax.ShapeDtypeStruct((n_pad, rep), out_dtype),
            grid=(n_pad // tm,),
            in_specs=[
                pl.BlockSpec((tm, k_total), lambda i: (i, 0)),     # x row tile
                pl.BlockSpec((k_total, rep), lambda i: (0, 0)),    # w6 resident
                pl.BlockSpec((1, rep), lambda i: (0, 0)),          # b6 resident
                pl.BlockSpec((rep, rep), lambda i: (0, 0)),        # w7 resident
                pl.BlockSpec((1, rep), lambda i: (0, 0)),          # b7 resident
            ],
            out_specs=pl.BlockSpec((tm, rep), lambda i: (i, 0)),
            compiler_params=pltpu.CompilerParams(
                dimension_semantics=("parallel",),
                vmem_limit_bytes=vmem_limit),
        )(x2d, w6_t, b6_2d, w7_t, b7_2d)
    else:
        tk = _pick_tk(k_total, tk)
        streamed_bytes = (2 * tm * tk * xb + 2 * tk * rep * wb
                          + 2 * rep * rep * wb + 4 * rep * 4
                          + 2 * tm * rep * ob + tm * rep * 4 + slack)
        vmem_limit = int(min(max(streamed_bytes, 32 * 1024 * 1024), budget))
        out = pl.pallas_call(
            _streamed_kernel,
            out_shape=jax.ShapeDtypeStruct((n_pad, rep), out_dtype),
            grid=(n_pad // tm, k_total // tk),
            in_specs=[
                pl.BlockSpec((tm, tk), lambda i, k: (i, k)),       # x tile
                pl.BlockSpec((tk, rep), lambda i, k: (k, 0)),      # w6 K slice
                pl.BlockSpec((1, rep), lambda i, k: (0, 0)),       # b6 resident
                pl.BlockSpec((rep, rep), lambda i, k: (0, 0)),     # w7 resident
                pl.BlockSpec((1, rep), lambda i, k: (0, 0)),       # b7 resident
            ],
            out_specs=pl.BlockSpec((tm, rep), lambda i, k: (i, 0)),
            scratch_shapes=[pltpu.VMEM((tm, rep), jnp.float32)],
            compiler_params=pltpu.CompilerParams(
                dimension_semantics=("parallel", "arbitrary"),
                vmem_limit_bytes=vmem_limit),
        )(x2d, w6_t, b6_2d, w7_t, b7_2d)

    if out_features is None:
        out_features = rep
    return out[:n, :out_features]


def _init_linear(key, out_features, in_features):
    """Deterministic init mimicking nn.Linear's kaiming-uniform defaults."""
    kw, kb = jax.random.split(key)
    bound = 1.0 / jnp.sqrt(in_features)
    w = jax.random.uniform(kw, (out_features, in_features),
                           minval=-bound, maxval=bound, dtype=jnp.float32)
    b = jax.random.uniform(kb, (out_features,),
                           minval=-bound, maxval=bound, dtype=jnp.float32)
    return w, b


if __name__ == "__main__":
    # Small shapes consistent with the module:
    # (N, C, H, W) = (2, 4, 16, 16) -> in_channels = 1024, representation = 128.
    N, C, H, W = 2, 4, 16, 16
    in_channels = C * H * W
    representation_size = 128

    key = jax.random.PRNGKey(0)
    kx, k6, k7 = jax.random.split(key, 3)
    x = jax.random.normal(kx, (N, C, H, W), dtype=jnp.float32)
    w6, b6 = _init_linear(k6, representation_size, in_channels)
    w7, b7 = _init_linear(k7, representation_size, representation_size)

    # Pure-JAX reference of the forward semantics.
    hi = jax.lax.Precision.HIGHEST
    x_flat = x.reshape(N, -1)
    ref = jnp.maximum(jnp.dot(x_flat, w6.T, precision=hi) + b6, 0.0)
    ref = jnp.maximum(jnp.dot(ref, w7.T, precision=hi) + b7, 0.0)

    # 1) f32 weights, auto schedule (resident w6, single K pass): tight tol.
    p32 = prepare_params(w6, b6, w7, b7, weight_dtype=jnp.float32)
    out = jax.block_until_ready(
        two_mlp_head(x, *p32, out_features=representation_size))
    assert out.shape == (N, representation_size)
    assert jnp.allclose(out, ref, atol=1e-4, rtol=1e-4), \
        float(jnp.max(jnp.abs(out - ref)))

    # 2) f32 weights, forced K-streamed schedule (grid=(1,4), exercises the
    #    accumulator pipeline): tight tolerance.
    out_s = jax.block_until_ready(
        two_mlp_head(x, *p32, tm=8, tk=256, out_features=representation_size,
                     residency="streamed"))
    assert jnp.allclose(out_s, ref, atol=1e-4, rtol=1e-4), \
        float(jnp.max(jnp.abs(out_s - ref)))

    # 3) Default bf16 weights (half the weight HBM/VMEM traffic).  bf16 input
    #    rounding means a looser tolerance vs the f32 reference is expected.
    pbf = prepare_params(w6, b6, w7, b7)
    out_b = jax.block_until_ready(
        two_mlp_head(x, *pbf, out_features=representation_size))
    assert jnp.allclose(out_b, ref, atol=5e-2, rtol=5e-2), \
        float(jnp.max(jnp.abs(out_b - ref)))

    print("KERNEL_OK")
</pallas_src>

<mosaic_0001>
module attributes {stable_mosaic.version = 11 : i64} {
  func.func @_fused_kernel(%arg0: i32, %arg1: memref<8x1024xf32, #tpu.memory_space<vmem>>, %arg2: memref<1024x128xf32, #tpu.memory_space<vmem>>, %arg3: memref<1x128xf32, #tpu.memory_space<vmem>>, %arg4: memref<128x128xf32, #tpu.memory_space<vmem>>, %arg5: memref<1x128xf32, #tpu.memory_space<vmem>>, %arg6: memref<8x128xf32, #tpu.memory_space<vmem>>) attributes {dimension_semantics = [#tpu.dimension_semantics<parallel>], iteration_bounds = array<i64: 1>, scalar_prefetch = 0 : i64, scratch_operands = 0 : i64, tpu.core_type = #tpu.core_type<tc>, window_params = [{transform_indices = @transform_0, window_bounds = array<i64: 8, 1024>}, {pipeline_mode = #tpu.pipeline_mode<synchronous>, transform_indices = @transform_1, window_bounds = array<i64: 1024, 128>}, {pipeline_mode = #tpu.pipeline_mode<synchronous>, transform_indices = @transform_2, window_bounds = array<i64: 1, 128>}, {pipeline_mode = #tpu.pipeline_mode<synchronous>, transform_indices = @transform_3, window_bounds = array<i64: 128, 128>}, {pipeline_mode = #tpu.pipeline_mode<synchronous>, transform_indices = @transform_4, window_bounds = array<i64: 1, 128>}, {transform_indices = @transform_5, window_bounds = array<i64: 8, 128>}]} {
    %c0 = arith.constant 0 : index
    %c0_0 = arith.constant 0 : index
    %0 = vector.load %arg1[%c0, %c0_0] : memref<8x1024xf32, #tpu.memory_space<vmem>>, vector<8x1024xf32>
    %c0_1 = arith.constant 0 : index
    %c0_2 = arith.constant 0 : index
    %1 = vector.load %arg2[%c0_1, %c0_2] : memref<1024x128xf32, #tpu.memory_space<vmem>>, vector<1024x128xf32>
    %cst = arith.constant dense<0.000000e+00> : vector<8x128xf32>
    %2 = tpu.matmul %0, %1, %cst {dimension_numbers = #tpu.dot_dimension_numbers<[1], [0], [0], [1], [0, 0, 1, 1], [], []>} : vector<8x1024xf32>, vector<1024x128xf32>, vector<8x128xf32> -> vector<8x128xf32>
    %c0_3 = arith.constant 0 : index
    %c0_4 = arith.constant 0 : index
    %3 = vector.load %arg3[%c0_3, %c0_4] : memref<1x128xf32, #tpu.memory_space<vmem>>, vector<1x128xf32>
    %4 = vector.broadcast %3 : vector<1x128xf32> to vector<8x128xf32>
    %5 = arith.addf %2, %4 : vector<8x128xf32>
    %cst_5 = arith.constant 0.000000e+00 : f32
    %6 = vector.broadcast %cst_5 : f32 to vector<8x128xf32>
    %7 = arith.maximumf %5, %6 : vector<8x128xf32>
    %c0_6 = arith.constant 0 : index
    %c0_7 = arith.constant 0 : index
    %8 = vector.load %arg4[%c0_6, %c0_7] : memref<128x128xf32, #tpu.memory_space<vmem>>, vector<128x128xf32>
    %cst_8 = arith.constant dense<0.000000e+00> : vector<8x128xf32>
    %9 = tpu.matmul %7, %8, %cst_8 {dimension_numbers = #tpu.dot_dimension_numbers<[1], [0], [0], [1], [0, 0, 1, 1], [], []>} : vector<8x128xf32>, vector<128x128xf32>, vector<8x128xf32> -> vector<8x128xf32>
    %c0_9 = arith.constant 0 : index
    %c0_10 = arith.constant 0 : index
    %10 = vector.load %arg5[%c0_9, %c0_10] : memref<1x128xf32, #tpu.memory_space<vmem>>, vector<1x128xf32>
    %11 = vector.broadcast %10 : vector<1x128xf32> to vector<8x128xf32>
    %12 = arith.addf %9, %11 : vector<8x128xf32>
    %cst_11 = arith.constant 0.000000e+00 : f32
    %13 = vector.broadcast %cst_11 : f32 to vector<8x128xf32>
    %14 = arith.maximumf %12, %13 : vector<8x128xf32>
    %c0_12 = arith.constant 0 : index
    %c0_13 = arith.constant 0 : index
    %15 = vector.load %arg6[%c0_12, %c0_13] : memref<8x128xf32, #tpu.memory_space<vmem>>, vector<8x128xf32>
    tpu.vector_store %arg6[%c0_12, %c0_13], %14 {strides = array<i32>} : memref<8x128xf32, #tpu.memory_space<vmem>>, vector<8x128xf32>,
    return
  }
  func.func @transform_0(%arg0: i32) -> (i32, i32) {
    %c0_i32 = arith.constant 0 : i32
    %c0_i32_0 = arith.constant 0 : i32
    return %arg0, %c0_i32 : i32, i32
  }
  func.func @transform_1(%arg0: i32) -> (i32, i32) {
    %c0_i32 = arith.constant 0 : i32
    %c0_i32_0 = arith.constant 0 : i32
    %c0_i32_1 = arith.constant 0 : i32
    return %c0_i32, %c0_i32_0 : i32, i32
  }
  func.func @transform_2(%arg0: i32) -> (i32, i32) {
    %c0_i32 = arith.constant 0 : i32
    %c0_i32_0 = arith.constant 0 : i32
    %c0_i32_1 = arith.constant 0 : i32
    return %c0_i32, %c0_i32_0 : i32, i32
  }
  func.func @transform_3(%arg0: i32) -> (i32, i32) {
    %c0_i32 = arith.constant 0 : i32
    %c0_i32_0 = arith.constant 0 : i32
    %c0_i32_1 = arith.constant 0 : i32
    return %c0_i32, %c0_i32_0 : i32, i32
  }
  func.func @transform_4(%arg0: i32) -> (i32, i32) {
    %c0_i32 = arith.constant 0 : i32
    %c0_i32_0 = arith.constant 0 : i32
    %c0_i32_1 = arith.constant 0 : i32
    return %c0_i32, %c0_i32_0 : i32, i32
  }
  func.func @transform_5(%arg0: i32) -> (i32, i32) {
    %c0_i32 = arith.constant 0 : i32
    %c0_i32_0 = arith.constant 0 : i32
    return %arg0, %c0_i32 : i32, i32
  }
}

</mosaic_0001>

<bundles_post_ra>
// kernel: two_mlp_head.1
= control target key start
LH: loop header
LB: loop body
LE: loop exit
PB: predicated region body
PF: predicated region fallthrough
CT: control target
= control target key end

     0   :  { %10 = vsyncpa [#allocation3], 0  ;;  %s779_s18 = smov [#allocation2]   ;;  %s898_s0 = inlined_call_operand.vmem [shape: f32[8,1024], index: 0, kind: input, shape index: {}]   ;;  %s899_s1 = inlined_call_operand.hbm [shape: f32[1024,128], index: 1, kind: input, shape index: {}]   ;;  %s900_s2 = inlined_call_operand.vmem [shape: f32[1,128], index: 2, kind: input, shape index: {}]   ;;  %s901_s3 = inlined_call_operand.vmem [shape: f32[128,128], index: 3, kind: input, shape index: {}]   ;;  %s902_s4 = inlined_call_operand.vmem [shape: f32[1,128], index: 4, kind: input, shape index: {}]   ;;  %s903_s5 = inlined_call_operand.vmem [shape: f32[8,128], index: 5, kind: output, shape index: {}]  }
   0x1   :  { %s18_s19 = sshll.u32 %s779_s18, 4  ;;  %s19_s19 = int_to_ptr.vmem [resolvable:$true] %s18_s19 }
   0x2   :  { %s765_s20 = scalar_lea.vmem %s19_s19, 16384  ;;  %p770_p1 = scmp.lt.s32.totalorder %s19_s19, %s19_s19 }
   0x3   :  { %p766_p0 = scmp.ne.s32.totalorder %s19_s19, %s765_s20  ;;  %p771_p2 = scmp.lt.s32.totalorder %s765_s20, %s765_s20 }
   0x5   :  { %p772_p3 = por %p771_p2, %p770_p1 }
   0x7   :  { %p773_p4 = pnand %p772_p3, %p766_p0 }
   0x9   :  { %776 = shalt.err (!%p773_p4)
}
   0xa   :  { %s780_s21 = smov 128   ;;  %s781_s22 = smov 8  }
   0xb   :  { %24 = dma.hbm_to_vmem [thread:$0]  %s899_s1, 16384, %s19_s19, [#allocation3], %s780_s21, %s780_s21, %s781_s22  }
   0xc   :  { %777 = dma.done.wait [#allocation3], 16384  }
   0xd   :  { %778 = vsyncadd [#allocation3], 4294950912  ;;  %v73_v0 = vld [vmem:[#allocation2 + $0xf8] sm:$0xff]  ;;  %v72_v4 = vld [vmem:[#allocation2 + $0xf0] sm:$0xff]  ;;  %vm783_vm0 = vmmov 0  }
   0xe   :  { %v105_v1 = vld [vmem:[#allocation2 + $0x1f8] sm:$0xff]  ;;  %560 = vmatprep.subr.mxu0 %v73_v0  ;;  %v104_v5 = vld [vmem:[#allocation2 + $0x1f0] sm:$0xff]  ;;  %v71_v8 = vld [vmem:[#allocation2 + $0xe8] sm:$0xff] }
   0xf   :  { %v57_v2 = vld [vmem:[#allocation2 + $0x78] sm:$0xff]  ;;  %595 = vmatprep.subr.mxu1 %v105_v1  ;;  %v56_v6 = vld [vmem:[#allocation2 + $0x70] sm:$0xff]  ;;  %v103_v9 = vld [vmem:[#allocation2 + $0x1e8] sm:$0xff] }
  0x10   :  { %v89_v3 = vld [vmem:[#allocation2 + $0x178] sm:$0xff]  ;;  %561 = vmatpush3.msra.mxu0 %v57_v2  ;;  %v88_v7 = vld [vmem:[#allocation2 + $0x170] sm:$0xff]  ;;  %v55_v10 = vld [vmem:[#allocation2 + $0x68] sm:$0xff] }
  0x11   :  { %596 = vmatpush3.msra.mxu1 %v89_v3  ;;  %562 = vmatprep.subr.mxu0 %v72_v4  ;;  %v87_v11 = vld [vmem:[#allocation2 + $0x168] sm:$0xff]  ;;  %v70_v12 = vld [vmem:[#allocation2 + $0xe0] sm:$0xff]  ;;  %v69_v16 = vld [vmem:[#allocation2 + $0xd8] sm:$0xff] }
  0x12   :  { %597 = vmatprep.subr.mxu1 %v104_v5  ;;  %563 = vmatpush3.msra.mxu0 %v56_v6  ;;  %v102_v13 = vld [vmem:[#allocation2 + $0x1e0] sm:$0xff]  ;;  %v101_v17 = vld [vmem:[#allocation2 + $0x1d8] sm:$0xff]  ;;  %v68_v20 = vld [vmem:[#allocation2 + $0xd0] sm:$0xff] }
  0x13   :  { %598 = vmatpush3.msra.mxu1 %v88_v7  ;;  %564 = vmatprep.subr.mxu0 %v71_v8  ;;  %v54_v14 = vld [vmem:[#allocation2 + $0x60] sm:$0xff]  ;;  %v53_v18 = vld [vmem:[#allocation2 + $0x58] sm:$0xff]  ;;  %v100_v21 = vld [vmem:[#allocation2 + $0x1d0] sm:$0xff] }
  0x14   :  { %599 = vmatprep.subr.mxu1 %v103_v9  ;;  %v86_v15 = vld [vmem:[#allocation2 + $0x160] sm:$0xff]  ;;  %565 = vmatpush3.msra.mxu0 %v55_v10  ;;  %v85_v19 = vld [vmem:[#allocation2 + $0x158] sm:$0xff]  ;;  %v52_v22 = vld [vmem:[#allocation2 + $0x50] sm:$0xff] }
  0x15   :  { %600 = vmatpush3.msra.mxu1 %v87_v11  ;;  %566 = vmatprep.subr.mxu0 %v70_v12  ;;  %v84_v23 = vld [vmem:[#allocation2 + $0x150] sm:$0xff]  ;;  %v67_v24 = vld [vmem:[#allocation2 + $0xc8] sm:$0xff]  ;;  %v66_v28 = vld [vmem:[#allocation2 + $0xc0] sm:$0xff] }
  0x16   :  { %601 = vmatprep.subr.mxu1 %v102_v13  ;;  %567 = vmatpush3.msra.mxu0 %v54_v14  ;;  %v99_v25 = vld [vmem:[#allocation2 + $0x1c8] sm:$0xff]  ;;  %v98_v29 = vld [vmem:[#allocation2 + $0x1c0] sm:$0xff]  ;;  %v65_v32 = vld [vmem:[#allocation2 + $0xb8] sm:$0xff] }
  0x17   :  { %602 = vmatpush3.msra.mxu1 %v86_v15  ;;  %568 = vmatprep.subr.mxu0 %v69_v16  ;;  %v51_v26 = vld [vmem:[#allocation2 + $0x48] sm:$0xff]  ;;  %v50_v30 = vld [vmem:[#allocation2 + $0x40] sm:$0xff]  ;;  %v97_v33 = vld [vmem:[#allocation2 + $0x1b8] sm:$0xff] }
  0x18   :  { %603 = vmatprep.subr.mxu1 %v101_v17  ;;  %569 = vmatpush3.msra.mxu0 %v53_v18  ;;  %v83_v27 = vld [vmem:[#allocation2 + $0x148] sm:$0xff]  ;;  %v82_v31 = vld [vmem:[#allocation2 + $0x140] sm:$0xff]  ;;  %v49_v34 = vld [vmem:[#allocation2 + $0x38] sm:$0xff] }
  0x19   :  { %604 = vmatpush3.msra.mxu1 %v85_v19  ;;  %570 = vmatprep.subr.mxu0 %v68_v20  ;;  %v81_v35 = vld [vmem:[#allocation2 + $0x138] sm:$0xff]  ;;  %v64_v36 = vld [vmem:[#allocation2 + $0xb0] sm:$0xff]  ;;  %v63_v40 = vld [vmem:[#allocation2 + $0xa8] sm:$0xff] }
  0x1a   :  { %605 = vmatprep.subr.mxu1 %v100_v21  ;;  %571 = vmatpush3.msra.mxu0 %v52_v22  ;;  %v96_v37 = vld [vmem:[#allocation2 + $0x1b0] sm:$0xff]  ;;  %v95_v41 = vld [vmem:[#allocation2 + $0x1a8] sm:$0xff]  ;;  %v62_v44 = vld [vmem:[#allocation2 + $0xa0] sm:$0xff] }
  0x1b   :  { %606 = vmatpush3.msra.mxu1 %v84_v23  ;;  %572 = vmatprep.subr.mxu0 %v67_v24  ;;  %v48_v38 = vld [vmem:[#allocation2 + $0x30] sm:$0xff]  ;;  %v47_v42 = vld [vmem:[#allocation2 + $0x28] sm:$0xff]  ;;  %v94_v45 = vld [vmem:[#allocation2 + $0x1a0] sm:$0xff] }
  0x1c   :  { %607 = vmatprep.subr.mxu1 %v99_v25  ;;  %573 = vmatpush3.msra.mxu0 %v51_v26  ;;  %v80_v39 = vld [vmem:[#allocation2 + $0x130] sm:$0xff]  ;;  %v79_v43 = vld [vmem:[#allocation2 + $0x128] sm:$0xff]  ;;  %v46_v46 = vld [vmem:[#allocation2 + $0x20] sm:$0xff] }
  0x1d   :  { %608 = vmatpush3.msra.mxu1 %v83_v27  ;;  %574 = vmatprep.subr.mxu0 %v66_v28  ;;  %v78_v47 = vld [vmem:[#allocation2 + $0x120] sm:$0xff]  ;;  %v61_v48 = vld [vmem:[#allocation2 + $0x98] sm:$0xff]  ;;  %v60_v52 = vld [vmem:[#allocation2 + $0x90] sm:$0xff] }
  0x1e   :  { %609 = vmatprep.subr.mxu1 %v98_v29  ;;  %575 = vmatpush3.msra.mxu0 %v50_v30  ;;  %v93_v49 = vld [vmem:[#allocation2 + $0x198] sm:$0xff]  ;;  %v92_v53 = vld [vmem:[#allocation2 + $0x190] sm:$0xff]  ;;  %v59_v56 = vld [vmem:[#allocation2 + $0x88] sm:$0xff] }
  0x1f   :  { %610 = vmatpush3.msra.mxu1 %v82_v31  ;;  %576 = vmatprep.subr.mxu0 %v65_v32  ;;  %v45_v50 = vld [vmem:[#allocation2 + $0x18] sm:$0xff]  ;;  %v44_v54 = vld [vmem:[#allocation2 + $0x10] sm:$0xff]  ;;  %v91_v57 = vld [vmem:[#allocation2 + $0x188] sm:$0xff] }
  0x20   :  { %611 = vmatprep.subr.mxu1 %v97_v33  ;;  %577 = vmatpush3.msra.mxu0 %v49_v34  ;;  %v77_v51 = vld [vmem:[#allocation2 + $0x118] sm:$0xff]  ;;  %v76_v55 = vld [vmem:[#allocation2 + $0x110] sm:$0xff]  ;;  %v43_v58 = vld [vmem:[#allocation2 + $0x8] sm:$0xff] }
  0x21   :  { %612 = vmatpush3.msra.mxu1 %v81_v35  ;;  %578 = vmatprep.subr.mxu0 %v64_v36  ;;  %v75_v59 = vld [vmem:[#allocation2 + $0x108] sm:$0xff]  ;;  %v58_v60 = vld [vmem:[#allocation2 + $0x80] sm:$0xff]  ;;  %v37_v2 = vld [vmem:[%s898_s0 + $0x18] sm:$0xff] }
  0x22   :  { %613 = vmatprep.subr.mxu1 %v96_v37  ;;  %579 = vmatpush3.msra.mxu0 %v48_v38  ;;  %v90_v61 = vld [vmem:[#allocation2 + $0x180] sm:$0xff]  ;;  %v35_v63 = vld [vmem:[%s898_s0 + $0x8] sm:$0xff]  ;;  %v137_v3 = vld [vmem:[#allocation2 + $0x2f8] sm:$0xff] }
  0x23   :  { %614 = vmatpush3.msra.mxu1 %v80_v39  ;;  %580 = vmatprep.subr.mxu0 %v63_v40  ;;  %v42_v62 = vld [vmem:[#allocation2] sm:$0xff]  ;;  %v169_v4 = vld [vmem:[#allocation2 + $0x3f8] sm:$0xff]  ;;  %v36_v5 = vld [vmem:[%s898_s0 + $0x10] sm:$0xff] }
  0x24   :  { %615 = vmatprep.subr.mxu1 %v95_v41  ;;  %581 = vmatpush3.msra.mxu0 %v47_v42  ;;  %v74_v0 = vld [vmem:[#allocation2 + $0x100] sm:$0xff]  ;;  %v121_v6 = vld [vmem:[#allocation2 + $0x278] sm:$0xff]  ;;  %v136_v8 = vld [vmem:[#allocation2 + $0x2f0] sm:$0xff] }
  0x25   :  { %616 = vmatpush3.msra.mxu1 %v79_v43  ;;  %582 = vmatprep.subr.mxu0 %v62_v44  ;;  %v34_v1 = vld [vmem:[%s898_s0] sm:$0xff]  ;;  %v153_v7 = vld [vmem:[#allocation2 + $0x378] sm:$0xff]  ;;  %v168_v9 = vld [vmem:[#allocation2 + $0x3f0] sm:$0xff] }
  0x26   :  { %617 = vmatprep.subr.mxu1 %v94_v45  ;;  %583 = vmatpush3.msra.mxu0 %v46_v46  ;;  %v120_v10 = vld [vmem:[#allocation2 + $0x270] sm:$0xff]  ;;  %v135_v12 = vld [vmem:[#allocation2 + $0x2e8] sm:$0xff]  ;;  %v134_v16 = vld [vmem:[#allocation2 + $0x2e0] sm:$0xff] }
  0x27   :  { %618 = vmatpush3.msra.mxu1 %v78_v47  ;;  %584 = vmatprep.subr.mxu0 %v61_v48  ;;  %v152_v11 = vld [vmem:[#allocation2 + $0x370] sm:$0xff]  ;;  %v167_v13 = vld [vmem:[#allocation2 + $0x3e8] sm:$0xff]  ;;  %v166_v17 = vld [vmem:[#allocation2 + $0x3e0] sm:$0xff] }
  0x28   :  { %619 = vmatprep.subr.mxu1 %v93_v49  ;;  %585 = vmatpush3.msra.mxu0 %v45_v50  ;;  %v119_v14 = vld [vmem:[#allocation2 + $0x268] sm:$0xff]  ;;  %v118_v18 = vld [vmem:[#allocation2 + $0x260] sm:$0xff]  ;;  %v133_v20 = vld [vmem:[#allocation2 + $0x2d8] sm:$0xff] }
  0x29   :  { %620 = vmatpush3.msra.mxu1 %v77_v51  ;;  %586 = vmatprep.subr.mxu0 %v60_v52  ;;  %v151_v15 = vld [vmem:[#allocation2 + $0x368] sm:$0xff]  ;;  %v150_v19 = vld [vmem:[#allocation2 + $0x360] sm:$0xff]  ;;  %v165_v21 = vld [vmem:[#allocation2 + $0x3d8] sm:$0xff] }
  0x2a   :  { %621 = vmatprep.subr.mxu1 %v92_v53  ;;  %587 = vmatpush3.msra.mxu0 %v44_v54  ;;  %v117_v22 = vld [vmem:[#allocation2 + $0x258] sm:$0xff]  ;;  %v132_v24 = vld [vmem:[#allocation2 + $0x2d0] sm:$0xff]  ;;  %v131_v28 = vld [vmem:[#allocation2 + $0x2c8] sm:$0xff] }
  0x2b   :  { %622 = vmatpush3.msra.mxu1 %v76_v55  ;;  %588 = vmatprep.subr.mxu0 %v59_v56  ;;  %v149_v23 = vld [vmem:[#allocation2 + $0x358] sm:$0xff]  ;;  %v164_v25 = vld [vmem:[#allocation2 + $0x3d0] sm:$0xff]  ;;  %v163_v29 = vld [vmem:[#allocation2 + $0x3c8] sm:$0xff] }
  0x2c   :  { %623 = vmatprep.subr.mxu1 %v91_v57  ;;  %589 = vmatpush3.msra.mxu0 %v43_v58  ;;  %v116_v26 = vld [vmem:[#allocation2 + $0x250] sm:$0xff]  ;;  %v115_v30 = vld [vmem:[#allocation2 + $0x248] sm:$0xff]  ;;  %v130_v32 = vld [vmem:[#allocation2 + $0x2c0] sm:$0xff] }
  0x2d   :  { %624 = vmatpush3.msra.mxu1 %v75_v59  ;;  %590 = vmatprep.subr.mxu0 %v58_v60  ;;  %v148_v27 = vld [vmem:[#allocation2 + $0x350] sm:$0xff]  ;;  %v147_v31 = vld [vmem:[#allocation2 + $0x348] sm:$0xff]  ;;  %v162_v33 = vld [vmem:[#allocation2 + $0x3c0] sm:$0xff] }
  0x2e   :  { %625 = vmatprep.subr.mxu1 %v90_v61  ;;  %591 = vmatpush3.msra.mxu0 %v42_v62  ;;  %v114_v34 = vld [vmem:[#allocation2 + $0x240] sm:$0xff]  ;;  %v129_v36 = vld [vmem:[#allocation2 + $0x2b8] sm:$0xff]  ;;  %v128_v40 = vld [vmem:[#allocation2 + $0x2b0] sm:$0xff] }
  0x2f   :  { %241 = vmatprep.mubr.f32.mxu0 %v35_v63  ;;  %626 = vmatpush3.msra.mxu1 %v74_v0  ;;  %v146_v35 = vld [vmem:[#allocation2 + $0x340] sm:$0xff]  ;;  %v161_v37 = vld [vmem:[#allocation2 + $0x3b8] sm:$0xff]  ;;  %v160_v41 = vld [vmem:[#allocation2 + $0x3b0] sm:$0xff] }
  0x30   :  { %242 = vmatmul.mubr.f32.vlgmr.msra.gmra.mxu0 %v34_v1  ;;  %311 = vmatprep.mubr.f32.mxu1 %v37_v2  ;;  %v113_v38 = vld [vmem:[#allocation2 + $0x238] sm:$0xff]  ;;  %v112_v42 = vld [vmem:[#allocation2 + $0x230] sm:$0xff]  ;;  %v127_v44 = vld [vmem:[#allocation2 + $0x2a8] sm:$0xff] }
  0x31   :  { %630 = vmatprep.subr.mxu0 %v137_v3  ;;  %665 = vmatprep.subr.mxu1 %v169_v4  ;;  %v145_v39 = vld [vmem:[#allocation2 + $0x338] sm:$0xff]  ;;  %v144_v43 = vld [vmem:[#allocation2 + $0x330] sm:$0xff]  ;;  %v159_v45 = vld [vmem:[#allocation2 + $0x3a8] sm:$0xff] }
  0x32   :  { %312 = vmatmul.mubr.f32.vlgmr.msra.gmra.mxu1 %v36_v5  ;;  %631 = vmatpush3.msra.mxu0 %v121_v6  ;;  %v111_v46 = vld [vmem:[#allocation2 + $0x228] sm:$0xff]  ;;  %v126_v48 = vld [vmem:[#allocation2 + $0x2a0] sm:$0xff]  ;;  %v125_v52 = vld [vmem:[#allocation2 + $0x298] sm:$0xff] }
  0x33   :  { %666 = vmatpush3.msra.mxu1 %v153_v7  ;;  %632 = vmatprep.subr.mxu0 %v136_v8  ;;  %v143_v47 = vld [vmem:[#allocation2 + $0x328] sm:$0xff]  ;;  %v158_v49 = vld [vmem:[#allocation2 + $0x3a0] sm:$0xff]  ;;  %v157_v53 = vld [vmem:[#allocation2 + $0x398] sm:$0xff] }
  0x34   :  { %667 = vmatprep.subr.mxu1 %v168_v9  ;;  %633 = vmatpush3.msra.mxu0 %v120_v10  ;;  %v110_v50 = vld [vmem:[#allocation2 + $0x220] sm:$0xff]  ;;  %v109_v54 = vld [vmem:[#allocation2 + $0x218] sm:$0xff]  ;;  %v124_v56 = vld [vmem:[#allocation2 + $0x290] sm:$0xff]  ;;  %v782_v9 = vmov 0.0  }
  0x35   :  { %668 = vmatpush3.msra.mxu1 %v152_v11  ;;  %634 = vmatprep.subr.mxu0 %v135_v12  ;;  %v142_v51 = vld [vmem:[#allocation2 + $0x320] sm:$0xff]  ;;  %v141_v55 = vld [vmem:[#allocation2 + $0x318] sm:$0xff]  ;;  %v156_v57 = vld [vmem:[#allocation2 + $0x390] sm:$0xff] }
  0x36   :  { %669 = vmatprep.subr.mxu1 %v167_v13  ;;  %635 = vmatpush3.msra.mxu0 %v119_v14  ;;  %v108_v58 = vld [vmem:[#allocation2 + $0x210] sm:$0xff]  ;;  %v123_v60 = vld [vmem:[#allocation2 + $0x288] sm:$0xff]  ;;  %v122_v0 = vld [vmem:[#allocation2 + $0x280] sm:$0xff] }
  0x37   :  { %670 = vmatpush3.msra.mxu1 %v151_v15  ;;  %636 = vmatprep.subr.mxu0 %v134_v16  ;;  %v140_v59 = vld [vmem:[#allocation2 + $0x310] sm:$0xff]  ;;  %v155_v61 = vld [vmem:[#allocation2 + $0x388] sm:$0xff]  ;;  %v154_v1 = vld [vmem:[#allocation2 + $0x380] sm:$0xff] }
  0x38   :  { %671 = vmatprep.subr.mxu1 %v166_v17  ;;  %637 = vmatpush3.msra.mxu0 %v118_v18  ;;  %v107_v62 = vld [vmem:[#allocation2 + $0x208] sm:$0xff]  ;;  %v106_v2 = vld [vmem:[#allocation2 + $0x200] sm:$0xff]  ;;  %v41_v5 = vld [vmem:[%s898_s0 + $0x38] sm:$0xff] }
  0x39   :  { %672 = vmatpush3.msra.mxu1 %v150_v19  ;;  %638 = vmatprep.subr.mxu0 %v133_v20  ;;  %v139_v63 = vld [vmem:[#allocation2 + $0x308] sm:$0xff]  ;;  %v138_v4 = vld [vmem:[#allocation2 + $0x300] sm:$0xff]  ;;  %v40_v7 = vld [vmem:[%s898_s0 + $0x30] sm:$0xff] }
  0x3a   :  { %673 = vmatprep.subr.mxu1 %v165_v21  ;;  %639 = vmatpush3.msra.mxu0 %v117_v22  ;;  %v39_v3 = vld [vmem:[%s898_s0 + $0x28] sm:$0xff]  ;;  %v38_v6 = vld [vmem:[%s898_s0 + $0x20] sm:$0xff]  ;;  %v473_v8 = vld [vmem:[%s901_s3 + $0x78] sm:$0xff] }
  0x3b   :  { %674 = vmatpush3.msra.mxu1 %v149_v23  ;;  %640 = vmatprep.subr.mxu0 %v132_v24  ;;  %v472_v10 = vld [vmem:[%s901_s3 + $0x70] sm:$0xff]  ;;  %v471_v11 = vld [vmem:[%s901_s3 + $0x68] sm:$0xff]  ;;  %v470_v12 = vld [vmem:[%s901_s3 + $0x60] sm:$0xff] }
  0x3c   :  { %675 = vmatprep.subr.mxu1 %v164_v25  ;;  %641 = vmatpush3.msra.mxu0 %v116_v26  ;;  %v469_v13 = vld [vmem:[%s901_s3 + $0x58] sm:$0xff]  ;;  %v468_v14 = vld [vmem:[%s901_s3 + $0x50] sm:$0xff]  ;;  %v467_v15 = vld [vmem:[%s901_s3 + $0x48] sm:$0xff] }
  0x3d   :  { %676 = vmatpush3.msra.mxu1 %v148_v27  ;;  %642 = vmatprep.subr.mxu0 %v131_v28  ;;  %v466_v16 = vld [vmem:[%s901_s3 + $0x40] sm:$0xff]  ;;  %v465_v17 = vld [vmem:[%s901_s3 + $0x38] sm:$0xff]  ;;  %v464_v18 = vld [vmem:[%s901_s3 + $0x30] sm:$0xff] }
  0x3e   :  { %677 = vmatprep.subr.mxu1 %v163_v29  ;;  %643 = vmatpush3.msra.mxu0 %v115_v30  ;;  %v463_v19 = vld [vmem:[%s901_s3 + $0x28] sm:$0xff]  ;;  %v462_v20 = vld [vmem:[%s901_s3 + $0x20] sm:$0xff]  ;;  %v461_v21 = vld [vmem:[%s901_s3 + $0x18] sm:$0xff] }
  0x3f   :  { %678 = vmatpush3.msra.mxu1 %v147_v31  ;;  %644 = vmatprep.subr.mxu0 %v130_v32  ;;  %v460_v22 = vld [vmem:[%s901_s3 + $0x10] sm:$0xff]  ;;  %v459_v23 = vld [vmem:[%s901_s3 + $0x8] sm:$0xff]  ;;  %v458_v24 = vld [vmem:[%s901_s3] sm:$0xff] }
  0x40   :  { %679 = vmatprep.subr.mxu1 %v162_v33  ;;  %645 = vmatpush3.msra.mxu0 %v114_v34  ;;  %v558_v29 = vld [vmem:[%s900_s2] ss:$0 sm:$0xff] }
  0x41   :  { %680 = vmatpush3.msra.mxu1 %v146_v35  ;;  %646 = vmatprep.subr.mxu0 %v129_v36 }
  0x42   :  { %681 = vmatprep.subr.mxu1 %v161_v37  ;;  %647 = vmatpush3.msra.mxu0 %v113_v38 }
  0x43   :  { %682 = vmatpush3.msra.mxu1 %v145_v39  ;;  %648 = vmatprep.subr.mxu0 %v128_v40 }
  0x44   :  { %683 = vmatprep.subr.mxu1 %v160_v41  ;;  %649 = vmatpush3.msra.mxu0 %v112_v42 }
  0x45   :  { %684 = vmatpush3.msra.mxu1 %v144_v43  ;;  %650 = vmatprep.subr.mxu0 %v127_v44  ;;  %v559_v43 = vld [vmem:[%s902_s4] ss:$0 sm:$0xff] }
  0x46   :  { %685 = vmatprep.subr.mxu1 %v159_v45  ;;  %651 = vmatpush3.msra.mxu0 %v111_v46 }
  0x47   :  { %686 = vmatpush3.msra.mxu1 %v143_v47  ;;  %652 = vmatprep.subr.mxu0 %v126_v48 }
  0x48   :  { %687 = vmatprep.subr.mxu1 %v158_v49  ;;  %653 = vmatpush3.msra.mxu0 %v110_v50 }
  0x49   :  { %688 = vmatpush3.msra.mxu1 %v142_v51  ;;  %654 = vmatprep.subr.mxu0 %v125_v52 }
  0x4a   :  { %689 = vmatprep.subr.mxu1 %v157_v53  ;;  %655 = vmatpush3.msra.mxu0 %v109_v54 }
  0x4b   :  { %690 = vmatpush3.msra.mxu1 %v141_v55  ;;  %656 = vmatprep.subr.mxu0 %v124_v56 }
  0x4c   :  { %691 = vmatprep.subr.mxu1 %v156_v57  ;;  %657 = vmatpush3.msra.mxu0 %v108_v58 }
  0x4d   :  { %692 = vmatpush3.msra.mxu1 %v140_v59  ;;  %658 = vmatprep.subr.mxu0 %v123_v60 }
  0x4e   :  { %693 = vmatprep.subr.mxu1 %v155_v61  ;;  %659 = vmatpush3.msra.mxu0 %v107_v62 }
  0x4f   :  { %694 = vmatpush3.msra.mxu1 %v139_v63  ;;  %660 = vmatprep.subr.mxu0 %v122_v0 }
  0x50   :  { %695 = vmatprep.subr.mxu1 %v154_v1  ;;  %661 = vmatpush3.msra.mxu0 %v106_v2 }
  0x51   :  { %381 = vmatprep.mubr.f32.mxu0 %v39_v3  ;;  %696 = vmatpush3.msra.mxu1 %v138_v4 }
  0x52   :  { %451 = vmatprep.mubr.f32.mxu1 %v41_v5  ;;  %382 = vmatmul.mubr.f32.vlgmr.msra.gmra.mxu0 %v38_v6 }
  0x53   :  { %452 = vmatmul.mubr.f32.vlgmr.msra.gmra.mxu1 %v40_v7  ;;  %717 = vmatprep.subr.mxu0 %v782_v9 }
  0x54   :  { %718 = vmatpush3.msra.mxu0 %v473_v8  ;;  %749 = vmatprep.mubr.msk.f32.mxu0 %vm783_vm0, %v782_v9 }
  0x55   :  { %719 = vmatprep.subr.mxu0 %v782_v9 }
  0x56   :  { %720 = vmatpush3.msra.mxu0 %v472_v10 }
  0x57   :  { %721 = vmatprep.subr.mxu0 %v782_v9 }
  0x58   :  { %722 = vmatpush3.msra.mxu0 %v471_v11 }
  0x59   :  { %723 = vmatprep.subr.mxu0 %v782_v9 }
  0x5a   :  { %724 = vmatpush3.msra.mxu0 %v470_v12 }
  0x5b   :  { %725 = vmatprep.subr.mxu0 %v782_v9 }
  0x5c   :  { %726 = vmatpush3.msra.mxu0 %v469_v13 }
  0x5d   :  { %727 = vmatprep.subr.mxu0 %v782_v9 }
  0x5e   :  { %728 = vmatpush3.msra.mxu0 %v468_v14 }
  0x5f   :  { %729 = vmatprep.subr.mxu0 %v782_v9 }
  0x60   :  { %730 = vmatpush3.msra.mxu0 %v467_v15 }
  0x61   :  { %731 = vmatprep.subr.mxu0 %v782_v9 }
  0x62   :  { %732 = vmatpush3.msra.mxu0 %v466_v16 }
  0x63   :  { %733 = vmatprep.subr.mxu0 %v782_v9 }
  0x64   :  { %734 = vmatpush3.msra.mxu0 %v465_v17 }
  0x65   :  { %735 = vmatprep.subr.mxu0 %v782_v9 }
  0x66   :  { %736 = vmatpush3.msra.mxu0 %v464_v18 }
  0x67   :  { %737 = vmatprep.subr.mxu0 %v782_v9 }
  0x68   :  { %738 = vmatpush3.msra.mxu0 %v463_v19 }
  0x69   :  { %739 = vmatprep.subr.mxu0 %v782_v9 }
  0x6a   :  { %740 = vmatpush3.msra.mxu0 %v462_v20 }
  0x6b   :  { %741 = vmatprep.subr.mxu0 %v782_v9 }
  0x6c   :  { %742 = vmatpush3.msra.mxu0 %v461_v21 }
  0x6d   :  { %743 = vmatprep.subr.mxu0 %v782_v9 }
  0x6e   :  { %744 = vmatpush3.msra.mxu0 %v460_v22 }
  0x6f   :  { %745 = vmatprep.subr.mxu0 %v782_v9 }
  0x70   :  { %746 = vmatpush3.msra.mxu0 %v459_v23 }
  0x71   :  { %747 = vmatprep.subr.mxu0 %v782_v9 }
  0x72   :  { %748 = vmatpush3.msra.mxu0 %v458_v24 }
  0xf0   :  { %v592_v25 = vpop.f32.mrf.mxu0 }
  0xf2   :  { %v627_v26 = vpop.f32.mrf.mxu1  ;;  %v593_v27 = vpop.f32.mrf.mxu0 }
  0xf3   :  { %v594_v28 = vadd.f32 %v593_v27, %v592_v25 }
  0xf4   :  { %v628_v30 = vpop.f32.mrf.mxu1 }
  0xf5   :  { %v244_v31 = vadd.f32 %v594_v28, %v558_v29  ;;  %v629_v32 = vadd.f32 %v628_v30, %v627_v26 }
  0xf7   :  { %v314_v37 = vadd.f32 %v629_v32, %v244_v31 }
 0x112   :  { %v662_v33 = vpop.f32.mrf.mxu0 }
 0x113   :  { %v697_v34 = vpop.f32.mrf.mxu1 }
 0x114   :  { %v663_v35 = vpop.f32.mrf.mxu0 }
 0x115   :  { %v698_v36 = vpop.f32.mrf.mxu1  ;;  %v664_v38 = vadd.f32 %v663_v35, %v662_v33 }
 0x116   :  { %v699_v40 = vadd.f32 %v698_v36, %v697_v34 }
 0x117   :  { %v384_v39 = vadd.f32 %v664_v38, %v314_v37 }
 0x119   :  { %v454_v41 = vadd.f32 %v699_v40, %v384_v39 }
 0x11b   :  { %v457_v42 = vmax.f32 %v454_v41, 0.0 }
 0x11d   :  { %750 = vmatmul.mubr.f32.vlgmr.msra.gmra.mxu0 %v457_v42 }
 0x1dd   :  { %v547_v44 = vpop.f32.mrf.mxu0 }
 0x1de   :  { %v548_v45 = vadd.f32 %v559_v43, %v547_v44 }
 0x1df   :  { %v751_v46 = vpop.f32.mrf.mxu0 }
 0x1e0   :  { %v551_v47 = vmax.f32 %v548_v45, 0.0 }
 0x1e2   :  { %552 = vst [vmem:[%s903_s5] sm:$0xff] %v551_v47 }
 0x1e3   :  { %557 = vsyncpa [#allocation3], 1 }

</bundles_post_ra>
